<compile_context>
chip_gen: v7x
topology: tpu7x:2x2x1
jax: 0.10.0
libtpu: 0.0.40
codegen_flags: <defaults>
</compile_context>

<pallas_src>
import jax
import jax.numpy as jnp
from jax.experimental import pallas as pl
from jax.experimental.pallas import tpu as pltpu


def _backproject_kernel(params_ref, pix_ref, depth_ref, out_ref):
    """Back-project one point-tile of one (b, n) camera.

    params_ref : SMEM (BN*9,) folded affine per camera, layout per camera
                 [a00, a01, b0, a10, a11, b1, a20, a21, b2]
    pix_ref    : VMEM (2, TILE, 128)  pixel x / y planes (shared by cameras)
    depth_ref  : VMEM (1, TILE, 128)
    out_ref    : VMEM (1, 4, TILE, 128)  -> [X, Y, Z, 1]
    """
    cam = pl.program_id(1)                 # camera index along the BN grid axis
    base = cam * 9

    x = pix_ref[0]                         # (TILE, 128)
    y = pix_ref[1]
    d = depth_ref[0]

    def p(k):                              # scalar broadcast from SMEM
        return params_ref[base + k]

    out_ref[0, 0] = (p(0) * x + p(1) * y + p(2)) * d
    out_ref[0, 1] = (p(3) * x + p(4) * y + p(5)) * d
    out_ref[0, 2] = (p(6) * x + p(7) * y + p(8)) * d
    out_ref[0, 3] = jnp.ones_like(d)


def _choose_tiling(P, max_tile=1024):
    """Pick (padded row count, tile rows) for a lane-dense (rows, 128) layout.

    tile is a multiple of 8 (or equal to the full row count), and the padded
    row count is always divisible by tile.  max_tile=1024 keeps the
    double-buffered VMEM footprint (~7 MiB) far below every chip's limit.
    """
    rows = -(-P // 128)                    # ceil(P / 128)
    if rows <= max_tile:
        return rows, rows                  # single tile == full dim (allowed)
    for t in range(max_tile, 7, -1):       # largest multiple-of-8 divisor
        if t % 8 == 0 and rows % t == 0:
            return rows, t
    rows_pad = -(-rows // max_tile) * max_tile
    return rows_pad, max_tile              # rare fallback: pad to the tile


def backproject_depth2cam(depth, K, post_rot=None, post_trans=None):
    """JAX/Pallas equivalent of BackprojectDepth2Cam.forward.

    depth: (B*N, 1, H, W); K: (B, N, 3, 3);
    post_rot: (B, N, 3, 3) or None; post_trans: (B, N, 3) or None.
    Returns cam_points: (B, N, 4, H*W) float32.
    """
    B, N = int(K.shape[0]), int(K.shape[1])
    BN = B * N
    _, _, H, W = depth.shape
    assert int(depth.shape[0]) == BN
    P = H * W

    Pr, tile = _choose_tiling(P)
    P_pad = Pr * 128
    n_tiles = Pr // tile

    # ---- pixel grid: built once, shared by every camera (constant block) ----
    xs = jax.lax.broadcasted_iota(jnp.float32, (H, W), 1).reshape(-1)   # x = w
    ys = jax.lax.broadcasted_iota(jnp.float32, (H, W), 0).reshape(-1)   # y = h
    if P_pad != P:
        xs = jnp.pad(xs, (0, P_pad - P))
        ys = jnp.pad(ys, (0, P_pad - P))
    pix = jnp.stack([xs.reshape(Pr, 128), ys.reshape(Pr, 128)], axis=0)

    # ---- fold post_rot^-1, K^-1 and -post_trans into one affine per camera ----
    # (3x3 inversions are scalar glue work, done in plain JAX)
    inv_K = jnp.linalg.inv(K.astype(jnp.float32).reshape(BN, 3, 3))
    if post_rot is not None and post_trans is not None:
        pr_inv = jnp.linalg.inv(post_rot.astype(jnp.float32).reshape(BN, 3, 3))
        M = inv_K @ pr_inv                                         # (BN, 3, 3)
        tvec = post_trans.astype(jnp.float32).reshape(BN, 3, 1)
        bias = M[:, :, 2] - (M @ tvec)[:, :, 0]                    # (BN, 3)
    else:
        M = inv_K
        bias = M[:, :, 2]
    params = jnp.stack([M[:, :, 0], M[:, :, 1], bias], axis=2).reshape(-1)

    d = depth.astype(jnp.float32).reshape(BN, P)
    if P_pad != P:
        d = jnp.pad(d, ((0, 0), (0, P_pad - P)))
    depth_flat = d.reshape(BN, Pr, 128)

    out = pl.pallas_call(
        _backproject_kernel,
        out_shape=jax.ShapeDtypeStruct((BN, 4, Pr, 128), jnp.float32),
        grid=(n_tiles, BN),
        in_specs=[
            pl.BlockSpec(memory_space=pltpu.SMEM),                    # folded affines
            pl.BlockSpec((2, tile, 128), lambda t, i: (0, t, 0)),     # pixel grid
            pl.BlockSpec((1, tile, 128), lambda t, i: (i, t, 0)),     # depth
        ],
        out_specs=pl.BlockSpec((1, 4, tile, 128), lambda t, i: (i, 0, t, 0)),
        compiler_params=pltpu.CompilerParams(
            dimension_semantics=("parallel", "parallel")),
    )(params, pix, depth_flat)

    out = out.reshape(B, N, 4, P_pad)
    if P_pad != P:
        out = out[..., :P]
    return out


def _reference(depth, K, post_rot=None, post_trans=None):
    """Plain-JAX transcription of the torch forward (staged matmuls)."""
    B, N = int(K.shape[0]), int(K.shape[1])
    BN = B * N
    _, _, H, W = depth.shape
    P = H * W
    xs = jax.lax.broadcasted_iota(jnp.float32, (H, W), 1).reshape(-1)
    ys = jax.lax.broadcasted_iota(jnp.float32, (H, W), 0).reshape(-1)
    pix = jnp.stack([xs, ys, jnp.ones((P,), jnp.float32)], axis=0)     # (3, P)
    pix = jnp.broadcast_to(pix[None], (BN, 3, P))
    if post_rot is not None and post_trans is not None:
        pr_inv = jnp.linalg.inv(post_rot.astype(jnp.float32).reshape(BN, 3, 3))
        cam = pix - post_trans.astype(jnp.float32).reshape(BN, 3, 1)
        cam = pr_inv @ cam
    else:
        cam = pix
    inv_K = jnp.linalg.inv(K.astype(jnp.float32).reshape(BN, 3, 3))
    cam = inv_K @ cam
    cam = depth.astype(jnp.float32).reshape(BN, 1, P) * cam
    cam = jnp.concatenate([cam, jnp.ones((BN, 1, P), jnp.float32)], axis=1)
    return cam.reshape(B, N, 4, P)


if __name__ == "__main__":
    key = jax.random.PRNGKey(0)
    B, N, H, W = 2, 2, 16, 16
    BN = B * N

    k1, k2, k3 = jax.random.split(key, 3)
    depth = jax.random.uniform(k1, (BN, 1, H, W), minval=0.5, maxval=20.0,
                               dtype=jnp.float32)

    fx = fy = 20.0
    cx, cy = (W - 1) / 2.0, (H - 1) / 2.0
    K = jnp.broadcast_to(
        jnp.array([[fx, 0.0, cx], [0.0, fy, cy], [0.0, 0.0, 1.0]],
                  dtype=jnp.float32), (B, N, 3, 3))

    post_rot = (jnp.eye(3, dtype=jnp.float32)[None, None]
                + 0.01 * jax.random.normal(k2, (B, N, 3, 3), dtype=jnp.float32))
    post_trans = 0.5 * jax.random.normal(k3, (B, N, 3), dtype=jnp.float32)

    cam_points = backproject_depth2cam(depth, K, post_rot, post_trans)
    jax.block_until_ready(cam_points)
    assert cam_points.shape == (B, N, 4, H * W)

    ref = _reference(depth, K, post_rot, post_trans)
    assert jnp.allclose(cam_points, ref, rtol=1e-4, atol=1e-4), \
        float(jnp.max(jnp.abs(cam_points - ref)))

    # also exercise the post_rot / post_trans == None branch of the forward
    cam_points_nop = backproject_depth2cam(depth, K)
    jax.block_until_ready(cam_points_nop)
    ref_nop = _reference(depth, K, None, None)
    assert jnp.allclose(cam_points_nop, ref_nop, rtol=1e-4, atol=1e-4)

    # non-128-aligned H*W exercises the padding / slicing path
    H2, W2 = 6, 20
    depth2 = jax.random.uniform(k2, (BN, 1, H2, W2), minval=0.5, maxval=20.0,
                                dtype=jnp.float32)
    cam_points2 = backproject_depth2cam(depth2, K, post_rot, post_trans)
    jax.block_until_ready(cam_points2)
    ref2 = _reference(depth2, K, post_rot, post_trans)
    assert cam_points2.shape == (B, N, 4, H2 * W2)
    assert jnp.allclose(cam_points2, ref2, rtol=1e-4, atol=1e-4)

    print("KERNEL_OK")
</pallas_src>

<mosaic_0001>
module attributes {stable_mosaic.version = 11 : i64} {
  func.func @_backproject_kernel(%arg0: i32, %arg1: i32, %arg2: memref<36xf32, #tpu.memory_space<smem>>, %arg3: memref<2x2x128xf32, #tpu.memory_space<vmem>>, %arg4: memref<1x2x128xf32, #tpu.memory_space<vmem>>, %arg5: memref<1x4x2x128xf32, #tpu.memory_space<vmem>>) attributes {dimension_semantics = [#tpu.dimension_semantics<parallel>, #tpu.dimension_semantics<parallel>], iteration_bounds = array<i64: 1, 4>, scalar_prefetch = 0 : i64, scratch_operands = 0 : i64, tpu.core_type = #tpu.core_type<tc>, window_params = [{transform_indices = @transform_0, window_bounds = array<i64: 36>}, {transform_indices = @transform_1, window_bounds = array<i64: 2, 2, 128>}, {transform_indices = @transform_2, window_bounds = array<i64: 1, 2, 128>}, {transform_indices = @transform_3, window_bounds = array<i64: 1, 4, 2, 128>}]} {
    %c9_i32 = arith.constant 9 : i32
    %0 = arith.muli %arg1, %c9_i32 : i32
    %c0 = arith.constant 0 : index
    %c0_0 = arith.constant 0 : index
    %c0_1 = arith.constant 0 : index
    %1 = vector.load %arg3[%c0, %c0_0, %c0_1] : memref<2x2x128xf32, #tpu.memory_space<vmem>>, vector<1x2x128xf32>
    %2 = vector.shape_cast %1 : vector<1x2x128xf32> to vector<2x128xf32>
    %c1 = arith.constant 1 : index
    %c0_2 = arith.constant 0 : index
    %c0_3 = arith.constant 0 : index
    %3 = vector.load %arg3[%c1, %c0_2, %c0_3] : memref<2x2x128xf32, #tpu.memory_space<vmem>>, vector<1x2x128xf32>
    %4 = vector.shape_cast %3 : vector<1x2x128xf32> to vector<2x128xf32>
    %c0_4 = arith.constant 0 : index
    %c0_5 = arith.constant 0 : index
    %c0_6 = arith.constant 0 : index
    %5 = vector.load %arg4[%c0_4, %c0_5, %c0_6] : memref<1x2x128xf32, #tpu.memory_space<vmem>>, vector<1x2x128xf32>
    %6 = vector.shape_cast %5 : vector<1x2x128xf32> to vector<2x128xf32>
    %c0_i32 = arith.constant 0 : i32
    %7 = arith.addi %0, %c0_i32 : i32
    %8 = arith.index_cast %7 : i32 to index
    %9 = memref.load %arg2[%8] : memref<36xf32, #tpu.memory_space<smem>>
    %10 = vector.broadcast %9 : f32 to vector<2x128xf32>
    %11 = arith.mulf %10, %2 : vector<2x128xf32>
    %c1_i32 = arith.constant 1 : i32
    %12 = arith.addi %0, %c1_i32 : i32
    %13 = arith.index_cast %12 : i32 to index
    %14 = memref.load %arg2[%13] : memref<36xf32, #tpu.memory_space<smem>>
    %15 = vector.broadcast %14 : f32 to vector<2x128xf32>
    %16 = arith.mulf %15, %4 : vector<2x128xf32>
    %17 = arith.addf %11, %16 : vector<2x128xf32>
    %c2_i32 = arith.constant 2 : i32
    %18 = arith.addi %0, %c2_i32 : i32
    %19 = arith.index_cast %18 : i32 to index
    %20 = memref.load %arg2[%19] : memref<36xf32, #tpu.memory_space<smem>>
    %21 = vector.broadcast %20 : f32 to vector<2x128xf32>
    %22 = arith.addf %17, %21 : vector<2x128xf32>
    %23 = arith.mulf %22, %6 : vector<2x128xf32>
    %c0_7 = arith.constant 0 : index
    %c0_8 = arith.constant 0 : index
    %c0_9 = arith.constant 0 : index
    %c0_10 = arith.constant 0 : index
    %24 = vector.load %arg5[%c0_7, %c0_8, %c0_9, %c0_10] : memref<1x4x2x128xf32, #tpu.memory_space<vmem>>, vector<1x1x2x128xf32>
    %25 = vector.shape_cast %24 : vector<1x1x2x128xf32> to vector<2x128xf32>
    %26 = vector.shape_cast %23 : vector<2x128xf32> to vector<1x1x2x128xf32>
    tpu.vector_store %arg5[%c0_7, %c0_8, %c0_9, %c0_10], %26 {strides = array<i32>} : memref<1x4x2x128xf32, #tpu.memory_space<vmem>>, vector<1x1x2x128xf32>,
    %c3_i32 = arith.constant 3 : i32
    %27 = arith.addi %0, %c3_i32 : i32
    %28 = arith.index_cast %27 : i32 to index
    %29 = memref.load %arg2[%28] : memref<36xf32, #tpu.memory_space<smem>>
    %30 = vector.broadcast %29 : f32 to vector<2x128xf32>
    %31 = arith.mulf %30, %2 : vector<2x128xf32>
    %c4_i32 = arith.constant 4 : i32
    %32 = arith.addi %0, %c4_i32 : i32
    %33 = arith.index_cast %32 : i32 to index
    %34 = memref.load %arg2[%33] : memref<36xf32, #tpu.memory_space<smem>>
    %35 = vector.broadcast %34 : f32 to vector<2x128xf32>
    %36 = arith.mulf %35, %4 : vector<2x128xf32>
    %37 = arith.addf %31, %36 : vector<2x128xf32>
    %c5_i32 = arith.constant 5 : i32
    %38 = arith.addi %0, %c5_i32 : i32
    %39 = arith.index_cast %38 : i32 to index
    %40 = memref.load %arg2[%39] : memref<36xf32, #tpu.memory_space<smem>>
    %41 = vector.broadcast %40 : f32 to vector<2x128xf32>
    %42 = arith.addf %37, %41 : vector<2x128xf32>
    %43 = arith.mulf %42, %6 : vector<2x128xf32>
    %c0_11 = arith.constant 0 : index
    %c1_12 = arith.constant 1 : index
    %c0_13 = arith.constant 0 : index
    %c0_14 = arith.constant 0 : index
    %44 = vector.load %arg5[%c0_11, %c1_12, %c0_13, %c0_14] : memref<1x4x2x128xf32, #tpu.memory_space<vmem>>, vector<1x1x2x128xf32>
    %45 = vector.shape_cast %44 : vector<1x1x2x128xf32> to vector<2x128xf32>
    %46 = vector.shape_cast %43 : vector<2x128xf32> to vector<1x1x2x128xf32>
    tpu.vector_store %arg5[%c0_11, %c1_12, %c0_13, %c0_14], %46 {strides = array<i32>} : memref<1x4x2x128xf32, #tpu.memory_space<vmem>>, vector<1x1x2x128xf32>,
    %c6_i32 = arith.constant 6 : i32
    %47 = arith.addi %0, %c6_i32 : i32
    %48 = arith.index_cast %47 : i32 to index
    %49 = memref.load %arg2[%48] : memref<36xf32, #tpu.memory_space<smem>>
    %50 = vector.broadcast %49 : f32 to vector<2x128xf32>
    %51 = arith.mulf %50, %2 : vector<2x128xf32>
    %c7_i32 = arith.constant 7 : i32
    %52 = arith.addi %0, %c7_i32 : i32
    %53 = arith.index_cast %52 : i32 to index
    %54 = memref.load %arg2[%53] : memref<36xf32, #tpu.memory_space<smem>>
    %55 = vector.broadcast %54 : f32 to vector<2x128xf32>
    %56 = arith.mulf %55, %4 : vector<2x128xf32>
    %57 = arith.addf %51, %56 : vector<2x128xf32>
    %c8_i32 = arith.constant 8 : i32
    %58 = arith.addi %0, %c8_i32 : i32
    %59 = arith.index_cast %58 : i32 to index
    %60 = memref.load %arg2[%59] : memref<36xf32, #tpu.memory_space<smem>>
    %61 = vector.broadcast %60 : f32 to vector<2x128xf32>
    %62 = arith.addf %57, %61 : vector<2x128xf32>
    %63 = arith.mulf %62, %6 : vector<2x128xf32>
    %c0_15 = arith.constant 0 : index
    %c2 = arith.constant 2 : index
    %c0_16 = arith.constant 0 : index
    %c0_17 = arith.constant 0 : index
    %64 = vector.load %arg5[%c0_15, %c2, %c0_16, %c0_17] : memref<1x4x2x128xf32, #tpu.memory_space<vmem>>, vector<1x1x2x128xf32>
    %65 = vector.shape_cast %64 : vector<1x1x2x128xf32> to vector<2x128xf32>
    %66 = vector.shape_cast %63 : vector<2x128xf32> to vector<1x1x2x128xf32>
    tpu.vector_store %arg5[%c0_15, %c2, %c0_16, %c0_17], %66 {strides = array<i32>} : memref<1x4x2x128xf32, #tpu.memory_space<vmem>>, vector<1x1x2x128xf32>,
    %cst = arith.constant 1.000000e+00 : f32
    %67 = vector.broadcast %cst : f32 to vector<2x128xf32>
    %c0_18 = arith.constant 0 : index
    %c3 = arith.constant 3 : index
    %c0_19 = arith.constant 0 : index
    %c0_20 = arith.constant 0 : index
    %68 = vector.load %arg5[%c0_18, %c3, %c0_19, %c0_20] : memref<1x4x2x128xf32, #tpu.memory_space<vmem>>, vector<1x1x2x128xf32>
    %69 = vector.shape_cast %68 : vector<1x1x2x128xf32> to vector<2x128xf32>
    %70 = vector.shape_cast %67 : vector<2x128xf32> to vector<1x1x2x128xf32>
    tpu.vector_store %arg5[%c0_18, %c3, %c0_19, %c0_20], %70 {strides = array<i32>} : memref<1x4x2x128xf32, #tpu.memory_space<vmem>>, vector<1x1x2x128xf32>,
    return
  }
  func.func @transform_0(%arg0: i32, %arg1: i32) -> i32 {
    %c0_i32 = arith.constant 0 : i32
    %c0_i32_0 = arith.constant 0 : i32
    return %c0_i32 : i32
  }
  func.func @transform_1(%arg0: i32, %arg1: i32) -> (i32, i32, i32) {
    %c0_i32 = arith.constant 0 : i32
    %c0_i32_0 = arith.constant 0 : i32
    %c0_i32_1 = arith.constant 0 : i32
    return %c0_i32, %arg0, %c0_i32_0 : i32, i32, i32
  }
  func.func @transform_2(%arg0: i32, %arg1: i32) -> (i32, i32, i32) {
    %c0_i32 = arith.constant 0 : i32
    %c0_i32_0 = arith.constant 0 : i32
    return %arg1, %arg0, %c0_i32 : i32, i32, i32
  }
  func.func @transform_3(%arg0: i32, %arg1: i32) -> (i32, i32, i32, i32) {
    %c0_i32 = arith.constant 0 : i32
    %c0_i32_0 = arith.constant 0 : i32
    %c0_i32_1 = arith.constant 0 : i32
    return %arg1, %c0_i32, %arg0, %c0_i32_0 : i32, i32, i32, i32
  }
}

</mosaic_0001>

<bundles_post_ra>
// kernel: tpu_custom_call.1
= control target key start
LH: loop header
LB: loop body
LE: loop exit
PB: predicated region body
PF: predicated region fallthrough
CT: control target
= control target key end

     0   :  { %s973_s0 = inlined_call_operand.hbm [shape: f32[36], index: 0, kind: input, shape index: {}]   ;;  %s974_s1 = inlined_call_operand.hbm [shape: f32[2,2,128], index: 1, kind: input, shape index: {}]   ;;  %s975_s2 = inlined_call_operand.hbm [shape: f32[4,2,128], index: 2, kind: input, shape index: {}]   ;;  %s976_s3 = inlined_call_operand.hbm [shape: f32[4,4,2,128], index: 3, kind: output, shape index: {}]  }
   0x1   :  { %981 = sst [smem:[#allocation14_spill]] %s973_s0 }
   0x2   :  { %982 = sst [smem:[#allocation15_spill]] %s974_s1 }
   0x3   :  { %8 = vsyncpa [#allocation5], 0 }
   0x4   :  { %9 = vsyncpa [#allocation3], 0 }
   0x5   :  { %10 = vsyncpa [#allocation8], 0 }
   0x6   :  { %12 = vsyncpa [#allocation8 + $0x1], 0 }
   0x7   :  { %13 = vsyncpa [#allocation4], 0 }
   0x8   :  { %15 = vsyncpa [#allocation4 + $0x1], 0  ;;  %s717_s12 = smov 0   ;;  %s719_s13 = smov 0  }
   0x9   :  { %s721_s14 = smov 0   ;;  %s723_s15 = smov 0  }
   0xa   :  { %s725_s16 = smov 0   ;;  %s727_s17 = smov 0  }
   0xb LB: > { %s415_s18 = sadd.s32 4294967295, %s686_s17   ;;  %s416_s19 = sadd.s32 4294967294, %s686_s17   ;;  %s686_s17 = sphi %s727_s17, %s21_s17   ;;  %s682_s16 = sphi %s725_s16, %s1001_s16   ;;  %s678_s15 = sphi %s723_s15, %s1000_s15   ;;  %s674_s14 = sphi %s721_s14, %s999_s14   ;;  %s670_s13 = sphi %s719_s13, %s998_s13   ;;  %s666_s12 = sphi %s717_s12, %s997_s12  }
   0xc   : > { %p102_p0 = scmp.ne.s32.totalorder %s670_s13, %s666_s12  ;;  %p751_p1 = scmp.eq.s32.totalorder %s415_s18, 0 }
   0xd   : > { %p755_p2 = scmp.eq.s32.totalorder %s415_s18, 3  ;;  %p134_p3 = scmp.eq.s32.totalorder %s416_s19, 3 }
   0xe   : > { %s983_s20 = scalar_select %p751_p1, 1, 0 }
   0xf   : > { %p761_p4 = por %p751_p1, %p102_p0  ;;  %p417_p5 = scmp.ge.s32.totalorder %s686_s17, 1 }
  0x10   : > { %p766_p6 = por %p134_p3, %p102_p0  ;;  %p141_p7 = scmp.lt.s32.totalorder %s686_s17, 5 }
  0x11   : > { %s985_s22 = scalar_select %p761_p4, 1, 0 }
  0x12   : > { %s986_s23 = scalar_select %p766_p6, 1, 0 }
  0x13   : > { %p771_p8 = pnand %p417_p5, %p141_p7  ;;  %s688_s25 = smov [#allocation6]  }
  0x14   : > { %s164_s26 = sshll.u32 %s688_s25, 4  ;;  %s989_s0 = sld [smem:[#allocation14_spill]]  ;;  %s777_s26 = int_to_ptr.vmem [resolvable:$true] %s164_s26 }
  0x15   : > { %p449_p9 = pneg %p771_p8 }
  0x17   : > { %p781_p10 = pnand %p449_p9, %p751_p1 }
  0x19   : > { %p527_p12 = pneg %p781_p10 }
  0x1a   : > { %s525_s30 = scalar_lea.hbm %s989_s0, 16 }
  0x1b   : > { %p526_p11 = scmp.ne.s32.totalorder %s989_s0, %s525_s30  ;;  %p532_p3 = scmp.lt.u32.totalorder %s525_s30, %s989_s0 }
  0x1d   : > { %p528_p13 = pnand %p527_p12, %p526_p11 }
  0x1f   : > { %p529_p0 = pneg %p528_p13 }
  0x21   : > { %p534_p5 = pnand %p532_p3, %p529_p0 }
  0x23   : > { %537 = shalt.err (!%p534_p5)
}
  0x24   : > { %s689_s8 = smov [#allocation2]   ;;  %s990_s1 = sld [smem:[#allocation15_spill]] }
  0x25   : > { %452 = dma.hbm_to_smem (!%p781_p10), %s989_s0, 16, %s689_s8, [#allocation5]  }
  0x2a   : > { %s538_s19 = scalar_lea.hbm %s990_s1, 64 }
  0x2b   : > { %p539_p7 = scmp.ne.s32.totalorder %s990_s1, %s538_s19  ;;  %p545_p13 = scmp.lt.u32.totalorder %s538_s19, %s990_s1 }
  0x2d   : > { %p541_p9 = pnand %p539_p7, %p527_p12 }
  0x2f   : > { %p542_p11 = pneg %p541_p9 }
  0x31   : > { %p547_p0 = pnand %p545_p13, %p542_p11 }
  0x33   : > { %550 = shalt.err (!%p547_p0)
}
  0x34   : > { %s551_s4 = scalar_lea.vmem %s777_s26, 64  ;;  %p559_p4 = scmp.lt.s32.totalorder %s777_s26, %s777_s26 }
  0x35   : > { %p552_p3 = scmp.ne.s32.totalorder %s777_s26, %s551_s4  ;;  %p560_p7 = scmp.lt.s32.totalorder %s551_s4, %s551_s4 }
  0x37   : > { %p554_p5 = pnand %p552_p3, %p527_p12  ;;  %p561_p9 = por %p560_p7, %p559_p4 }
  0x39   : > { %p555_p6 = pneg %p554_p5 }
  0x3b   : > { %p562_p1 = pnand %p561_p9, %p555_p6 }
  0x3d   : > { %565 = shalt.err (!%p562_p1)
}
  0x3e   : > { %s690_s5 = smov 32   ;;  %s691_s6 = smov 2  }
  0x3f   : > { %455 = dma.hbm_to_vmem [thread:$0]  (!%p781_p10), %s990_s1, 64, %s777_s26, [#allocation3], %s690_s5, %s690_s5, %s691_s6  }
  0x40   : > { %s30_s9 = sadd.s32 1, %s682_s16  ;;  %s89_s10 = sadd.s32 1, %s674_s14 }
  0x41   : > { %p31_p1 = scmp.ge.s32.totalorder %s30_s9, 4  ;;  %p96_p4 = scmp.ne.s32.totalorder %s674_s14, %s670_s13 }
  0x42   : > { %p97_p6 = scmp.eq.s32.totalorder %s686_s17, 0  ;;  %p466_p12 = scmp.lt.s32.totalorder %s686_s17, 4 }
  0x43   : > { %s1003_s9 = smov (%p31_p1, %s30_s9), 0  ;;  %p839_p13 = por %p755_p2, %p96_p4 }
  0x44   : > { %p98_p11 = por %p97_p6, %p96_p4  ;;  %s84_s27 = ssub.s32 %s682_s16, %s1003_s9 }
  0x45   : > { %s991_s11 = scalar_select %p839_p13, 1, 0 }
  0x46   : > { %s178_s18 = sand.u32 1, %s674_s14   ;;  %p87_p0 = scmp.eq.s32.totalorder %s84_s27, 0 }
  0x47   : > { %s421_s26 = sshll.u32 %s178_s18, 1  ;;  %s422_s19 = sshll.u32 %s682_s16, 5 }
  0x48   : > { %s848_s25 = scalar_select %p87_p0, %s674_s14, %s89_s10  }
  0x49   : > { %s853_s30 = scalar_lea.hbm %s975_s2, %s422_s19  ;;  %s182_s21 = scalar_lea.vmem [#allocation7], %s421_s26 }
  0x4a   : > { %s190_s4 = sshll.u32 %s182_s21, 4  ;;  %p857_p2 = pnand %p466_p12, %p98_p11  ;;  %s861_s4 = int_to_ptr.vmem [resolvable:$true] %s190_s4 }
  0x4b   : > { %s179_s6 = scalar_lea.sflag [#allocation8], %s178_s18  ;;  %s566_s7 = scalar_lea.hbm %s853_s30, 32 }
  0x4c   : > { %p567_p10 = scmp.ne.s32.totalorder %s853_s30, %s566_s7  ;;  %p568_p3 = pneg %p857_p2 }
  0x4d   : > { %s571_s27 = scalar_lea.hbm %s975_s2, 128  ;;  %p572_p9 = scmp.lt.u32.totalorder %s853_s30, %s975_s2 }
  0x4e   : > { %p569_p5 = pnand %p568_p3, %p567_p10  ;;  %p573_p1 = scmp.lt.u32.totalorder %s571_s27, %s566_s7 }
  0x4f   : > { %p575_p6 = scmp.lt.u32.totalorder %s566_s7, %s853_s30 }
  0x50   : > { %p570_p7 = pneg %p569_p5  ;;  %p574_p4 = por %p573_p1, %p572_p9 }
  0x52   : > { %p576_p12 = por %p575_p6, %p574_p4 }
  0x54   : > { %p577_p11 = pnand %p576_p12, %p570_p7 }
  0x56   : > { %580 = shalt.err (!%p577_p11)
}
  0x57   : > { %s581_s18 = scalar_lea.vmem %s861_s4, 32  ;;  %s692_s28 = smov [#allocation7]  }
  0x58   : > { %p582_p0 = scmp.ne.s32.totalorder %s861_s4, %s581_s18  ;;  %s586_s29 = sshll.u32 %s692_s28, 4  ;;  %s587_s29 = int_to_ptr.vmem [resolvable:$false] %s586_s29 }
  0x59   : > { %s588_s21 = scalar_lea.vmem %s587_s29, 64  ;;  %p589_p13 = scmp.lt.s32.totalorder %s861_s4, %s587_s29 }
  0x5a   : > { %p584_p10 = pnand %p582_p0, %p568_p3  ;;  %p590_p9 = scmp.lt.s32.totalorder %s588_s21, %s581_s18 }
  0x5c   : > { %p585_p5 = pneg %p584_p10  ;;  %p591_p1 = por %p590_p9, %p589_p13 }
  0x5e   : > { %p592_p4 = pnand %p591_p1, %p585_p5 }
  0x60   : > { %595 = shalt.err (!%p592_p4)
}
  0x61   : > { %459 = dma.hbm_to_vmem [thread:$0]  (!%p857_p2), %s853_s30, 32, %s861_s4, %s179_s6  }
  0x62   : > { %199 = sbr.rel (%p771_p8) target bundleno = 153 (0x99), region = 32  ;;  %p993_p3 = scmp.ne.s32.totalorder (!%p771_p8), %s983_s20, 0 }
  0x69   : > { %649 = dma.done.wait (%p993_p3), [#allocation5], 16  }
  0x6a   : > { %651 = vsyncadd (%p993_p3), [#allocation5], 4294967280 }
  0x6b   : > { %653 = dma.done.wait (%p993_p3), [#allocation3], 64  }
  0x6c   : > { %655 = vsyncadd (%p993_p3), [#allocation3], 4294967232  ;;  %s899_s5 = sand.u32 1, %s670_s13   ;;  %p994_p8 = scmp.ne.s32.totalorder %s985_s22, 0 }
  0x6d   : > { %s426_s24 = sshll.u32 %s899_s5, 1  ;;  %s210_s30 = scalar_lea.sflag [#allocation8], %s899_s5 }
  0x6e   : > { %s903_s4 = scalar_lea.vmem [#allocation7], %s426_s24 }
  0x6f   : > { %657 = dma.done.wait (%p994_p8), %s210_s30, 32  }
  0x70   : > { %659 = vsyncadd (%p994_p8), %s210_s30, 4294967264 }
  0x71   : > { %218 = sfence }
  0x72   : > { %s427_s20 = sshll.u32 %s899_s5, 3  ;;  %s237_s6 = smul.u32 9, %s678_s15  ;;  %v693_v0 = vmov 1.0   ;;  %v238_v1 = vld [vmem:[#allocation6] sm:$0x3] }
  0x73   : > { %s911_s10 = scalar_lea.vmem [#allocation9], %s427_s20  ;;  %v240_v2 = vld [vmem:[#allocation6 + $0x2] sm:$0x3]  ;;  %v241_v10 = vld [vmem:[%s903_s4] sm:$0x3]  ;;  %s436_s4 = sshll.u32 %s678_s15, 7 }
  0x74   : > { %s242_s7 = sld [smem:[#allocation2 + %s237_s6]]  ;;  %s245_s8 = sadd.s32 1, %s237_s6  ;;  %430 = vst [vmem:[%s911_s10 + $0x6] sm:$0x3] %v693_v0 }
  0x75   : > { %s246_s27 = sld [smem:[#allocation2 + %s245_s8]]  ;;  %s250_s26 = sadd.s32 2, %s237_s6 }
  0x76   : > { %s251_s19 = sld [smem:[#allocation2 + %s250_s26]]  ;;  %s256_s18 = sadd.s32 3, %s237_s6 }
  0x77   : > { %s257_s28 = sld [smem:[#allocation2 + %s256_s18]]  ;;  %s260_s22 = sadd.s32 4, %s237_s6 }
  0x78   : > { %s261_s29 = sld [smem:[#allocation2 + %s260_s22]]  ;;  %s265_s21 = sadd.s32 5, %s237_s6 }
  0x79   : > { %s266_s24 = sld [smem:[#allocation2 + %s265_s21]]  ;;  %s272_s30 = sadd.s32 6, %s237_s6 }
  0x7a   : > { %v243_v3 = vstv %s242_s7  ;;  %s273_s20 = sld [smem:[#allocation2 + %s272_s30]]  ;;  %s276_s0 = sadd.s32 7, %s237_s6 }
  0x7b   : > { %v244_v4 = vmul.f32 %v243_v3, %v238_v1  ;;  %v247_v5 = vstv %s246_s27  ;;  %s277_s1 = sld [smem:[#allocation2 + %s276_s0]]  ;;  %s281_s8 = sadd.s32 8, %s237_s6 }
  0x7c   : > { %v248_v6 = vmul.f32 %v247_v5, %v240_v2  ;;  %v252_v7 = vstv %s251_s19  ;;  %s282_s26 = sld [smem:[#allocation2 + %s281_s8]]  ;;  %s305_s0 = sshll.u32 %s911_s10, 4  ;;  %s918_s0 = int_to_ptr.vmem [resolvable:$true] %s305_s0 }
  0x7d   : > { %v258_v9 = vstv %s257_s28  ;;  %s291_s27 = scalar_lea.sflag [#allocation4], %s899_s5  ;;  %s596_s19 = scalar_lea.vmem %s918_s0, 128 }
  0x7e   : > { %v249_v8 = vadd.f32 %v248_v6, %v244_v4  ;;  %v259_v11 = vmul.f32 %v258_v9, %v238_v1  ;;  %v262_v12 = vstv %s261_s29  ;;  %p597_p13 = scmp.ne.s32.totalorder %s918_s0, %s596_s19  ;;  %p995_p2 = scmp.ne.s32.totalorder %s991_s11, 0 }
  0x7f   : > { %v263_v14 = vmul.f32 %v262_v12, %v240_v2  ;;  %v267_v15 = vstv %s266_s24  ;;  %s694_s15 = smov [#allocation9]  }
  0x80   : > { %v253_v13 = vadd.f32 %v252_v7, %v249_v8  ;;  %v274_v16 = vstv %s273_s20  ;;  %p598_p7 = pnand %p597_p13, %p995_p2  ;;  %s600_s18 = sshll.u32 %s694_s15, 4  ;;  %s601_s18 = int_to_ptr.vmem [resolvable:$false] %s600_s18 }
  0x81   : > { %v264_v18 = vadd.f32 %v263_v14, %v259_v11  ;;  %v275_v19 = vmul.f32 %v274_v16, %v238_v1  ;;  %v278_v20 = vstv %s277_s1  ;;  %s924_s1 = scalar_lea.hbm %s976_s3, %s436_s4  ;;  %s602_s28 = scalar_lea.vmem %s601_s18, 256 }
  0x82   : > { %v254_v17 = vmul.f32 %v253_v13, %v241_v10  ;;  %v279_v21 = vmul.f32 %v278_v20, %v240_v2  ;;  %v283_v23 = vstv %s282_s26  ;;  %p599_p6 = pneg %p598_p7  ;;  %p603_p12 = scmp.lt.s32.totalorder %s918_s0, %s601_s18 }
  0x83   : > { %v268_v22 = vadd.f32 %v267_v15, %v264_v18  ;;  %p604_p11 = scmp.lt.s32.totalorder %s602_s28, %s596_s19 }
  0x84   : > { %255 = vst [vmem:[%s911_s10] sm:$0x3] %v254_v17  ;;  %v280_v24 = vadd.f32 %v279_v21, %v275_v19 }
  0x85   : > { %v269_v25 = vmul.f32 %v268_v22, %v241_v10  ;;  %p605_p0 = por %p604_p11, %p603_p12 }
  0x86   : > { %v284_v26 = vadd.f32 %v283_v23, %v280_v24 }
  0x87   : > { %428 = vst [vmem:[%s911_s10 + $0x2] sm:$0x3] %v269_v25  ;;  %p606_p10 = pnand %p605_p0, %p599_p6 }
  0x88   : > { %v285_v27 = vmul.f32 %v284_v26, %v241_v10 }
  0x8a   : > { %429 = vst [vmem:[%s911_s10 + $0x4] sm:$0x3] %v285_v27 }
  0x8b   : > { %609 = shalt.err (!%p606_p10)
}
  0x8c   : > { %s610_s10 = scalar_lea.hbm %s924_s1, 128  ;;  %s614_s21 = scalar_lea.hbm %s976_s3, 512 }
  0x8d   : > { %p611_p5 = scmp.ne.s32.totalorder %s924_s1, %s610_s10  ;;  %p615_p4 = scmp.lt.u32.totalorder %s924_s1, %s976_s3 }
  0x8e   : > { %p616_p3 = scmp.lt.u32.totalorder %s614_s21, %s610_s10  ;;  %p618_p13 = scmp.lt.u32.totalorder %s610_s10, %s924_s1 }
  0x8f   : > { %p612_p9 = pnand %p611_p5, %p995_p2 }
  0x90   : > { %p617_p8 = por %p616_p3, %p615_p4 }
  0x91   : > { %p613_p1 = pneg %p612_p9 }
  0x92   : > { %p619_p7 = por %p618_p13, %p617_p8 }
  0x94   : > { %p620_p6 = pnand %p619_p7, %p613_p1 }
  0x96   : > { %623 = shalt.err (!%p620_p6)
}
  0x97   : > { %s695_s20 = smov 32   ;;  %s696_s8 = smov 2  }
  0x98   : > { %447 = dma.vmem_to_hbm [thread:$0]  (%p995_p2), %s918_s0, 128, %s924_s1, %s291_s27, %s695_s20, %s695_s20, %s696_s8  }
  0x99 PF: > { %p469_p12 = scmp.ge.s32.totalorder %s686_s17, 2  ;;  %s320_s26 = sand.u32 1, %s666_s12  }
  0x9a   : > { %p996_p11 = scmp.ne.s32.totalorder %s986_s23, 0  ;;  %s321_s4 = scalar_lea.sflag [#allocation4], %s320_s26 }
  0x9c   : > { %p461_p0 = pnand %p469_p12, %p996_p11 }
  0x9e   : > { %661 = dma.done.wait (!%p461_p0), %s321_s4, 128  }
  0x9f   : > { %663 = vsyncadd (!%p461_p0), %s321_s4, 4294967168  ;;  %s21_s17 = sadd.s32 1, %s686_s17   ;;  %s997_s12 = smov %s670_s13 }
  0xa0   : > { %p18_p10 = scmp.ge.s32.totalorder %s21_s17, 6   ;;  %s998_s13 = smov %s674_s14 }
  0xa1   : > { %s999_s14 = smov %s848_s25  ;;  %s1000_s15 = smov %s682_s16 }
  0xa2   : > { %s1001_s16 = smov %s1003_s9  ;;  %20 = sbr.rel (!%p18_p10) target bundleno = 11 (0xb), region = 92 }
  0xa9   :  { %326 = vsyncpa [#allocation3], 1 }
  0xaa   :  { %328 = vsyncpa [#allocation3 + $0x1], 1 }
  0xab   :  { %329 = vsyncpa [#allocation8], 1 }
  0xac   :  { %331 = vsyncpa [#allocation8 + $0x1], 1 }
  0xad   :  { %332 = vsyncpa [#allocation4], 1 }
  0xae   :  { %334 = vsyncpa [#allocation4 + $0x1], 1 }
  0xaf   :  { %335 = vsyncpa [#allocation5], 1 }
  0xb0   :  { %337 = vsyncpa [#allocation5 + $0x1], 1 }

</bundles_post_ra>
